<compile_context>
chip_gen: v6e
topology: v6e:2x2x1
jax: 0.10.0
libtpu: 0.0.40
codegen_flags: <defaults>
</compile_context>

<pallas_src>
import functools

import jax
import jax.numpy as jnp
from jax import lax
from jax.experimental import pallas as pl
from jax.experimental.pallas import tpu as pltpu


def _attn_like_kernel(x_ref, w_ref, o_ref, *, num_heads, head_k, head_n):
    # x_ref: (1, M, H*K)  lane-dense packed activations (one batch element)
    # w_ref: (H*K, H*N)   block-diagonal weight (shared across the batch grid)
    # o_ref: (1, N, H*K)  lane-dense packed output
    xp = x_ref[0]                                   # (M, H*K)

    # ---- first GEMM: all heads in one MXU-native matmul -------------------
    v1 = jnp.dot(xp, w_ref[...], preferred_element_type=jnp.float32)  # (M, H*N)

    # v3 = v1^T / 31 followed by softmax over the last axis of v3 is exactly a
    # softmax over the M (sublane) axis of v1/31 — done once, full lane width.
    s = v1 * (1.0 / 31.0)
    m = jnp.max(s, axis=0, keepdims=True)           # (1, H*N) cross-sublane max
    e = jnp.exp(s - m)
    denom = jnp.sum(e, axis=0, keepdims=True)       # (1, H*N)
    p = e * (1.0 / denom)                           # (M, H*N), exact reciprocal

    # ---- second GEMM: per head, contract the M axis directly --------------
    # v5_h = softmax(v3)_h @ x_h = p_h^T @ x_h ; results land at static lane
    # offsets of the lane-dense output block (dense writeback DMA).
    for h in range(num_heads):
        p_h = p[:, h * head_n:(h + 1) * head_n]     # (M, N)
        x_h = xp[:, h * head_k:(h + 1) * head_k]    # (M, K)
        v5_h = lax.dot_general(
            p_h, x_h,
            dimension_numbers=(((0,), (0,)), ((), ())),
            preferred_element_type=jnp.float32)     # (N, K)
        o_ref[0, :, h * head_k:(h + 1) * head_k] = v5_h.astype(o_ref.dtype)


def model_forward(x, weight):
    """x: (B, H, M, K) f32, weight: (H, K, N) f32 -> (B, H, N, K) f32."""
    B, H, M, K = x.shape
    Hw, Kw, N = weight.shape
    assert Hw == H and Kw == K, "weight must match x's head / contraction dims"

    # Lane-dense packing (cheap XLA ops in the wrapper):
    #   x_packed[b, m, h*K + k]        = x[b, h, m, k]
    #   w_bd[h*K + k, g*N + n]         = weight[h, k, n] if h == g else 0
    x_packed = jnp.transpose(x, (0, 2, 1, 3)).reshape(B, M, H * K)
    eye = jnp.eye(H, dtype=weight.dtype)
    w_bd = (eye[:, None, :, None] * weight[:, :, None, :]).reshape(H * K, H * N)

    kernel = functools.partial(
        _attn_like_kernel, num_heads=H, head_k=K, head_n=N)

    out_packed = pl.pallas_call(
        kernel,
        out_shape=jax.ShapeDtypeStruct((B, N, H * K), x.dtype),
        grid=(B,),
        in_specs=[
            pl.BlockSpec((1, M, H * K), lambda b: (b, 0, 0)),
            pl.BlockSpec((H * K, H * N), lambda b: (0, 0)),
        ],
        out_specs=pl.BlockSpec((1, N, H * K), lambda b: (b, 0, 0)),
        compiler_params=pltpu.CompilerParams(
            dimension_semantics=("parallel",)),
    )(x_packed, w_bd)

    # (B, N, H*K) -> (B, H, N, K)
    return jnp.transpose(out_packed.reshape(B, N, H, K), (0, 2, 1, 3))


def model_forward_ref(x, weight):
    # Pure-JAX reference for correctness checking.
    v1 = jnp.einsum("bhmk,hkn->bhmn", x, weight)
    v3 = jnp.swapaxes(v1, -2, -1) / 31.0
    v4 = jax.nn.softmax(v3, axis=-1)
    return jnp.einsum("bhnm,bhmk->bhnk", v4, x)


if __name__ == "__main__":
    key = jax.random.PRNGKey(0)
    kx, kw = jax.random.split(key)
    # Shapes implied by the module: x (1, 8, 32, 32), weight (8, 32, 32)
    x = jax.random.normal(kx, (1, 8, 32, 32), dtype=jnp.float32)
    weight = jax.random.normal(kw, (8, 32, 32), dtype=jnp.float32)

    out = jax.block_until_ready(model_forward(x, weight))
    ref = model_forward_ref(x, weight)

    assert out.shape == (1, 8, 32, 32)
    # Tolerance covers any difference in default MXU precision between the
    # in-kernel matmuls and the XLA einsum reference.
    assert jnp.allclose(out, ref, atol=2e-3, rtol=2e-3), "mismatch vs reference"

    print("KERNEL_OK")
</pallas_src>

<mosaic_0001>
module attributes {stable_mosaic.version = 11 : i64} {
  func.func @_attn_like_kernel(%arg0: i32, %arg1: memref<1x32x256xf32, #tpu.memory_space<vmem>>, %arg2: memref<256x256xf32, #tpu.memory_space<vmem>>, %arg3: memref<1x32x256xf32, #tpu.memory_space<vmem>>) attributes {dimension_semantics = [#tpu.dimension_semantics<parallel>], iteration_bounds = array<i64: 1>, scalar_prefetch = 0 : i64, scratch_operands = 0 : i64, tpu.core_type = #tpu.core_type<tc>, window_params = [{transform_indices = @transform_0, window_bounds = array<i64: 1, 32, 256>}, {pipeline_mode = #tpu.pipeline_mode<synchronous>, transform_indices = @transform_1, window_bounds = array<i64: 256, 256>}, {transform_indices = @transform_2, window_bounds = array<i64: 1, 32, 256>}]} {
    %c0 = arith.constant 0 : index
    %c0_0 = arith.constant 0 : index
    %c0_1 = arith.constant 0 : index
    %0 = vector.load %arg1[%c0, %c0_0, %c0_1] : memref<1x32x256xf32, #tpu.memory_space<vmem>>, vector<1x32x256xf32>
    %1 = vector.shape_cast %0 : vector<1x32x256xf32> to vector<32x256xf32>
    %c0_2 = arith.constant 0 : index
    %c0_3 = arith.constant 0 : index
    %2 = vector.load %arg2[%c0_2, %c0_3] : memref<256x256xf32, #tpu.memory_space<vmem>>, vector<256x256xf32>
    %cst = arith.constant dense<0.000000e+00> : vector<32x256xf32>
    %3 = tpu.matmul %1, %2, %cst {dimension_numbers = #tpu.dot_dimension_numbers<[1], [0], [0], [1], [0, 0, 1, 1], [], []>} : vector<32x256xf32>, vector<256x256xf32>, vector<32x256xf32> -> vector<32x256xf32>
    %cst_4 = arith.constant 0.0322580636 : f32
    %4 = vector.broadcast %cst_4 : f32 to vector<32x256xf32>
    %5 = arith.mulf %3, %4 : vector<32x256xf32>
    %cst_5 = arith.constant dense<0xFF800000> : vector<256xf32>
    %6 = vector.multi_reduction <maximumf>, %5, %cst_5 [0] : vector<32x256xf32> to vector<256xf32>
    %7 = vector.shape_cast %6 : vector<256xf32> to vector<1x256xf32>
    %8 = vector.broadcast %7 : vector<1x256xf32> to vector<32x256xf32>
    %9 = arith.subf %5, %8 : vector<32x256xf32>
    %10 = math.exp %9 : vector<32x256xf32>
    %cst_6 = arith.constant dense<0.000000e+00> : vector<256xf32>
    %11 = vector.multi_reduction <add>, %10, %cst_6 [0] : vector<32x256xf32> to vector<256xf32>
    %12 = vector.shape_cast %11 : vector<256xf32> to vector<1x256xf32>
    %cst_7 = arith.constant 1.000000e+00 : f32
    %13 = vector.broadcast %cst_7 : f32 to vector<1x256xf32>
    %14 = arith.divf %13, %12 : vector<1x256xf32>
    %15 = vector.broadcast %14 : vector<1x256xf32> to vector<32x256xf32>
    %16 = arith.mulf %10, %15 : vector<32x256xf32>
    %17 = vector.extract_strided_slice %16 {offsets = [0, 0], sizes = [32, 32], strides = [1, 1]} : vector<32x256xf32> to vector<32x32xf32>
    %18 = vector.extract_strided_slice %1 {offsets = [0, 0], sizes = [32, 32], strides = [1, 1]} : vector<32x256xf32> to vector<32x32xf32>
    %cst_8 = arith.constant dense<0.000000e+00> : vector<32x32xf32>
    %19 = tpu.matmul %17, %18, %cst_8 {dimension_numbers = #tpu.dot_dimension_numbers<[0], [0], [1], [1], [0, 1, 1, 1], [], []>} : vector<32x32xf32>, vector<32x32xf32>, vector<32x32xf32> -> vector<32x32xf32>
    %c0_9 = arith.constant 0 : index
    %c0_10 = arith.constant 0 : index
    %c0_11 = arith.constant 0 : index
    %20 = vector.load %arg3[%c0_9, %c0_10, %c0_11] : memref<1x32x256xf32, #tpu.memory_space<vmem>>, vector<1x32x32xf32>
    %21 = vector.shape_cast %20 : vector<1x32x32xf32> to vector<32x32xf32>
    %22 = vector.shape_cast %19 : vector<32x32xf32> to vector<1x32x32xf32>
    tpu.vector_store %arg3[%c0_9, %c0_10, %c0_11], %22 {strides = array<i32>} : memref<1x32x256xf32, #tpu.memory_space<vmem>>, vector<1x32x32xf32>,
    %23 = vector.extract_strided_slice %16 {offsets = [0, 32], sizes = [32, 32], strides = [1, 1]} : vector<32x256xf32> to vector<32x32xf32>
    %24 = vector.extract_strided_slice %1 {offsets = [0, 32], sizes = [32, 32], strides = [1, 1]} : vector<32x256xf32> to vector<32x32xf32>
    %cst_12 = arith.constant dense<0.000000e+00> : vector<32x32xf32>
    %25 = tpu.matmul %23, %24, %cst_12 {dimension_numbers = #tpu.dot_dimension_numbers<[0], [0], [1], [1], [0, 1, 1, 1], [], []>} : vector<32x32xf32>, vector<32x32xf32>, vector<32x32xf32> -> vector<32x32xf32>
    %c0_13 = arith.constant 0 : index
    %c0_14 = arith.constant 0 : index
    %c32 = arith.constant 32 : index
    %26 = vector.load %arg3[%c0_13, %c0_14, %c32] : memref<1x32x256xf32, #tpu.memory_space<vmem>>, vector<1x32x32xf32>
    %27 = vector.shape_cast %26 : vector<1x32x32xf32> to vector<32x32xf32>
    %28 = vector.shape_cast %25 : vector<32x32xf32> to vector<1x32x32xf32>
    tpu.vector_store %arg3[%c0_13, %c0_14, %c32], %28 {strides = array<i32>} : memref<1x32x256xf32, #tpu.memory_space<vmem>>, vector<1x32x32xf32>,
    %29 = vector.extract_strided_slice %16 {offsets = [0, 64], sizes = [32, 32], strides = [1, 1]} : vector<32x256xf32> to vector<32x32xf32>
    %30 = vector.extract_strided_slice %1 {offsets = [0, 64], sizes = [32, 32], strides = [1, 1]} : vector<32x256xf32> to vector<32x32xf32>
    %cst_15 = arith.constant dense<0.000000e+00> : vector<32x32xf32>
    %31 = tpu.matmul %29, %30, %cst_15 {dimension_numbers = #tpu.dot_dimension_numbers<[0], [0], [1], [1], [0, 1, 1, 1], [], []>} : vector<32x32xf32>, vector<32x32xf32>, vector<32x32xf32> -> vector<32x32xf32>
    %c0_16 = arith.constant 0 : index
    %c0_17 = arith.constant 0 : index
    %c64 = arith.constant 64 : index
    %32 = vector.load %arg3[%c0_16, %c0_17, %c64] : memref<1x32x256xf32, #tpu.memory_space<vmem>>, vector<1x32x32xf32>
    %33 = vector.shape_cast %32 : vector<1x32x32xf32> to vector<32x32xf32>
    %34 = vector.shape_cast %31 : vector<32x32xf32> to vector<1x32x32xf32>
    tpu.vector_store %arg3[%c0_16, %c0_17, %c64], %34 {strides = array<i32>} : memref<1x32x256xf32, #tpu.memory_space<vmem>>, vector<1x32x32xf32>,
    %35 = vector.extract_strided_slice %16 {offsets = [0, 96], sizes = [32, 32], strides = [1, 1]} : vector<32x256xf32> to vector<32x32xf32>
    %36 = vector.extract_strided_slice %1 {offsets = [0, 96], sizes = [32, 32], strides = [1, 1]} : vector<32x256xf32> to vector<32x32xf32>
    %cst_18 = arith.constant dense<0.000000e+00> : vector<32x32xf32>
    %37 = tpu.matmul %35, %36, %cst_18 {dimension_numbers = #tpu.dot_dimension_numbers<[0], [0], [1], [1], [0, 1, 1, 1], [], []>} : vector<32x32xf32>, vector<32x32xf32>, vector<32x32xf32> -> vector<32x32xf32>
    %c0_19 = arith.constant 0 : index
    %c0_20 = arith.constant 0 : index
    %c96 = arith.constant 96 : index
    %38 = vector.load %arg3[%c0_19, %c0_20, %c96] : memref<1x32x256xf32, #tpu.memory_space<vmem>>, vector<1x32x32xf32>
    %39 = vector.shape_cast %38 : vector<1x32x32xf32> to vector<32x32xf32>
    %40 = vector.shape_cast %37 : vector<32x32xf32> to vector<1x32x32xf32>
    tpu.vector_store %arg3[%c0_19, %c0_20, %c96], %40 {strides = array<i32>} : memref<1x32x256xf32, #tpu.memory_space<vmem>>, vector<1x32x32xf32>,
    %41 = vector.extract_strided_slice %16 {offsets = [0, 128], sizes = [32, 32], strides = [1, 1]} : vector<32x256xf32> to vector<32x32xf32>
    %42 = vector.extract_strided_slice %1 {offsets = [0, 128], sizes = [32, 32], strides = [1, 1]} : vector<32x256xf32> to vector<32x32xf32>
    %cst_21 = arith.constant dense<0.000000e+00> : vector<32x32xf32>
    %43 = tpu.matmul %41, %42, %cst_21 {dimension_numbers = #tpu.dot_dimension_numbers<[0], [0], [1], [1], [0, 1, 1, 1], [], []>} : vector<32x32xf32>, vector<32x32xf32>, vector<32x32xf32> -> vector<32x32xf32>
    %c0_22 = arith.constant 0 : index
    %c0_23 = arith.constant 0 : index
    %c128 = arith.constant 128 : index
    %44 = vector.load %arg3[%c0_22, %c0_23, %c128] : memref<1x32x256xf32, #tpu.memory_space<vmem>>, vector<1x32x32xf32>
    %45 = vector.shape_cast %44 : vector<1x32x32xf32> to vector<32x32xf32>
    %46 = vector.shape_cast %43 : vector<32x32xf32> to vector<1x32x32xf32>
    tpu.vector_store %arg3[%c0_22, %c0_23, %c128], %46 {strides = array<i32>} : memref<1x32x256xf32, #tpu.memory_space<vmem>>, vector<1x32x32xf32>,
    %47 = vector.extract_strided_slice %16 {offsets = [0, 160], sizes = [32, 32], strides = [1, 1]} : vector<32x256xf32> to vector<32x32xf32>
    %48 = vector.extract_strided_slice %1 {offsets = [0, 160], sizes = [32, 32], strides = [1, 1]} : vector<32x256xf32> to vector<32x32xf32>
    %cst_24 = arith.constant dense<0.000000e+00> : vector<32x32xf32>
    %49 = tpu.matmul %47, %48, %cst_24 {dimension_numbers = #tpu.dot_dimension_numbers<[0], [0], [1], [1], [0, 1, 1, 1], [], []>} : vector<32x32xf32>, vector<32x32xf32>, vector<32x32xf32> -> vector<32x32xf32>
    %c0_25 = arith.constant 0 : index
    %c0_26 = arith.constant 0 : index
    %c160 = arith.constant 160 : index
    %50 = vector.load %arg3[%c0_25, %c0_26, %c160] : memref<1x32x256xf32, #tpu.memory_space<vmem>>, vector<1x32x32xf32>
    %51 = vector.shape_cast %50 : vector<1x32x32xf32> to vector<32x32xf32>
    %52 = vector.shape_cast %49 : vector<32x32xf32> to vector<1x32x32xf32>
    tpu.vector_store %arg3[%c0_25, %c0_26, %c160], %52 {strides = array<i32>} : memref<1x32x256xf32, #tpu.memory_space<vmem>>, vector<1x32x32xf32>,
    %53 = vector.extract_strided_slice %16 {offsets = [0, 192], sizes = [32, 32], strides = [1, 1]} : vector<32x256xf32> to vector<32x32xf32>
    %54 = vector.extract_strided_slice %1 {offsets = [0, 192], sizes = [32, 32], strides = [1, 1]} : vector<32x256xf32> to vector<32x32xf32>
    %cst_27 = arith.constant dense<0.000000e+00> : vector<32x32xf32>
    %55 = tpu.matmul %53, %54, %cst_27 {dimension_numbers = #tpu.dot_dimension_numbers<[0], [0], [1], [1], [0, 1, 1, 1], [], []>} : vector<32x32xf32>, vector<32x32xf32>, vector<32x32xf32> -> vector<32x32xf32>
    %c0_28 = arith.constant 0 : index
    %c0_29 = arith.constant 0 : index
    %c192 = arith.constant 192 : index
    %56 = vector.load %arg3[%c0_28, %c0_29, %c192] : memref<1x32x256xf32, #tpu.memory_space<vmem>>, vector<1x32x32xf32>
    %57 = vector.shape_cast %56 : vector<1x32x32xf32> to vector<32x32xf32>
    %58 = vector.shape_cast %55 : vector<32x32xf32> to vector<1x32x32xf32>
    tpu.vector_store %arg3[%c0_28, %c0_29, %c192], %58 {strides = array<i32>} : memref<1x32x256xf32, #tpu.memory_space<vmem>>, vector<1x32x32xf32>,
    %59 = vector.extract_strided_slice %16 {offsets = [0, 224], sizes = [32, 32], strides = [1, 1]} : vector<32x256xf32> to vector<32x32xf32>
    %60 = vector.extract_strided_slice %1 {offsets = [0, 224], sizes = [32, 32], strides = [1, 1]} : vector<32x256xf32> to vector<32x32xf32>
    %cst_30 = arith.constant dense<0.000000e+00> : vector<32x32xf32>
    %61 = tpu.matmul %59, %60, %cst_30 {dimension_numbers = #tpu.dot_dimension_numbers<[0], [0], [1], [1], [0, 1, 1, 1], [], []>} : vector<32x32xf32>, vector<32x32xf32>, vector<32x32xf32> -> vector<32x32xf32>
    %c0_31 = arith.constant 0 : index
    %c0_32 = arith.constant 0 : index
    %c224 = arith.constant 224 : index
    %62 = vector.load %arg3[%c0_31, %c0_32, %c224] : memref<1x32x256xf32, #tpu.memory_space<vmem>>, vector<1x32x32xf32>
    %63 = vector.shape_cast %62 : vector<1x32x32xf32> to vector<32x32xf32>
    %64 = vector.shape_cast %61 : vector<32x32xf32> to vector<1x32x32xf32>
    tpu.vector_store %arg3[%c0_31, %c0_32, %c224], %64 {strides = array<i32>} : memref<1x32x256xf32, #tpu.memory_space<vmem>>, vector<1x32x32xf32>,
    return
  }
  func.func @transform_0(%arg0: i32) -> (i32, i32, i32) {
    %c0_i32 = arith.constant 0 : i32
    %c0_i32_0 = arith.constant 0 : i32
    %c0_i32_1 = arith.constant 0 : i32
    return %arg0, %c0_i32, %c0_i32_0 : i32, i32, i32
  }
  func.func @transform_1(%arg0: i32) -> (i32, i32) {
    %c0_i32 = arith.constant 0 : i32
    %c0_i32_0 = arith.constant 0 : i32
    %c0_i32_1 = arith.constant 0 : i32
    return %c0_i32, %c0_i32_0 : i32, i32
  }
  func.func @transform_2(%arg0: i32) -> (i32, i32, i32) {
    %c0_i32 = arith.constant 0 : i32
    %c0_i32_0 = arith.constant 0 : i32
    %c0_i32_1 = arith.constant 0 : i32
    return %arg0, %c0_i32, %c0_i32_0 : i32, i32, i32
  }
}

</mosaic_0001>

<bundles_post_ra>
// kernel: tpu_custom_call.1
= control target key start
LH: loop header
LB: loop body
LE: loop exit
PB: predicated region body
PF: predicated region fallthrough
CT: control target
= control target key end

     0   :  { %7 = vsyncpa [#allocation3], 0  ;;  %s2287_s0 = inlined_call_operand.hbm [shape: f32[1,32,256], index: 0, kind: input, shape index: {}]   ;;  %s2288_s1 = inlined_call_operand.hbm [shape: f32[256,256], index: 1, kind: input, shape index: {}]   ;;  %s2289_s2 = inlined_call_operand.hbm [shape: f32[1,32,256], index: 2, kind: output, shape index: {}]  }
   0x1   :  { %8 = vsyncpa [#allocation6], 0 }
   0x2   :  { %9 = vsyncpa [#allocation4], 0  ;;  %s1926_s9 = smov [#allocation2]  }
   0x3   :  { %s15_s10 = sshll.u32 %s1926_s9, 4  ;;  %s16_s10 = int_to_ptr.vmem [resolvable:$true] %s15_s10 }
   0x4   :  { %s1868_s11 = scalar_lea.vmem %s16_s10, 1024  ;;  %p1873_p1 = scmp.lt.s32.totalorder %s16_s10, %s16_s10 }
   0x5   :  { %p1869_p0 = scmp.ne.s32.totalorder %s16_s10, %s1868_s11  ;;  %p1874_p2 = scmp.lt.s32.totalorder %s1868_s11, %s1868_s11 }
   0x7   :  { %p1875_p3 = por %p1874_p2, %p1873_p1 }
   0x9   :  { %p1876_p4 = pnand %p1875_p3, %p1869_p0 }
   0xb   :  { %1879 = shalt.err (!%p1876_p4)
}
   0xc   :  { %s1927_s12 = smov 256   ;;  %s1928_s13 = smov 16  }
   0xd   :  { %21 = dma.hbm_to_vmem [thread:$0]  %s2287_s0, 1024, %s16_s10, [#allocation3], %s1927_s12, %s1927_s12, %s1928_s13  }
   0xe   :  { %s1929_s16 = smov [#allocation5]  }
   0xf   :  { %s27_s17 = sshll.u32 %s1929_s16, 4  ;;  %s28_s17 = int_to_ptr.vmem [resolvable:$true] %s27_s17 }
  0x10   :  { %s1888_s18 = scalar_lea.vmem %s28_s17, 8192  ;;  %p1893_p6 = scmp.lt.s32.totalorder %s28_s17, %s28_s17 }
  0x11   :  { %p1889_p5 = scmp.ne.s32.totalorder %s28_s17, %s1888_s18  ;;  %p1894_p7 = scmp.lt.s32.totalorder %s1888_s18, %s1888_s18 }
  0x13   :  { %p1895_p8 = por %p1894_p7, %p1893_p6 }
  0x15   :  { %p1896_p9 = pnand %p1895_p8, %p1889_p5 }
  0x17   :  { %1899 = shalt.err (!%p1896_p9)
}
  0x18   :  { %33 = dma.hbm_to_vmem [thread:$0]  %s2288_s1, 8192, %s28_s17, [#allocation6], %s1927_s12, %s1927_s12, %s1928_s13  }
  0x19   :  { %1920 = dma.done.wait [#allocation3], 1024  }
  0x1a   :  { %1921 = vsyncadd [#allocation3], 4294966272 }
  0x1b   :  { %1922 = dma.done.wait [#allocation6], 8192  }
  0x1c   :  { %1923 = vsyncadd [#allocation6], 4294959104  ;;  %v79_v0 = vld [vmem:[#allocation5 + $0xf8] sm:$0xff]  ;;  %v78_v1 = vld [vmem:[#allocation5 + $0xf0] sm:$0xff]  ;;  %s1930_s0 = smov 96   ;;  %s1931_s1 = smov 64  }
  0x1d   :  { %v77_v2 = vld [vmem:[#allocation5 + $0xe8] sm:$0xff]  ;;  %112 = vmatprep.subr.mxu0 %v79_v0  ;;  %v76_v3 = vld [vmem:[#allocation5 + $0xe0] sm:$0xff]  ;;  %v75_v4 = vld [vmem:[#allocation5 + $0xd8] sm:$0xff]  ;;  %s1932_s21 = smov 32   ;;  %vm313_vm0 = vcmask 261120   ;;  %vm592_vm1 = vcmask 523520  }
  0x1e   :  { %113 = vmatpush1.msra.mxu0 %v78_v1  ;;  %v74_v5 = vld [vmem:[#allocation5 + $0xd0] sm:$0xff]  ;;  %v73_v6 = vld [vmem:[#allocation5 + $0xc8] sm:$0xff]  ;;  %v72_v7 = vld [vmem:[#allocation5 + $0xc0] sm:$0xff]  ;;  %vm766_vm2 = vcmask 785920   ;;  %vm940_vm3 = vcmask 1048320   ;;  %s1933_s22 = smov [#allocation7]  }
  0x1f   :  { %114 = vmatprep.subr.mxu0 %v77_v2  ;;  %v71_v8 = vld [vmem:[#allocation5 + $0xb8] sm:$0xff]  ;;  %v70_v9 = vld [vmem:[#allocation5 + $0xb0] sm:$0xff]  ;;  %v69_v10 = vld [vmem:[#allocation5 + $0xa8] sm:$0xff]  ;;  %s1610_s23 = sshll.u32 %s1933_s22, 4  ;;  %s1611_s23 = int_to_ptr.vmem [resolvable:$true] %s1610_s23 }
  0x20   :  { %115 = vmatpush1.msra.mxu0 %v76_v3  ;;  %v68_v11 = vld [vmem:[#allocation5 + $0xa0] sm:$0xff]  ;;  %v67_v12 = vld [vmem:[#allocation5 + $0x98] sm:$0xff]  ;;  %v66_v13 = vld [vmem:[#allocation5 + $0x90] sm:$0xff]  ;;  %s1900_s24 = scalar_lea.vmem %s1611_s23, 1024  ;;  %p1905_p11 = scmp.lt.s32.totalorder %s1611_s23, %s1611_s23 }
  0x21   :  { %116 = vmatprep.subr.mxu0 %v75_v4  ;;  %v65_v14 = vld [vmem:[#allocation5 + $0x88] sm:$0xff]  ;;  %v64_v15 = vld [vmem:[#allocation5 + $0x80] sm:$0xff]  ;;  %v63_v16 = vld [vmem:[#allocation5 + $0x78] sm:$0xff]  ;;  %p1901_p10 = scmp.ne.s32.totalorder %s1611_s23, %s1900_s24  ;;  %p1906_p12 = scmp.lt.s32.totalorder %s1900_s24, %s1900_s24 }
  0x22   :  { %117 = vmatpush1.msra.mxu0 %v74_v5  ;;  %v62_v17 = vld [vmem:[#allocation5 + $0x70] sm:$0xff]  ;;  %v61_v18 = vld [vmem:[#allocation5 + $0x68] sm:$0xff]  ;;  %v60_v19 = vld [vmem:[#allocation5 + $0x60] sm:$0xff] }
  0x23   :  { %118 = vmatprep.subr.mxu0 %v73_v6  ;;  %v59_v20 = vld [vmem:[#allocation5 + $0x58] sm:$0xff]  ;;  %v58_v21 = vld [vmem:[#allocation5 + $0x50] sm:$0xff]  ;;  %v57_v22 = vld [vmem:[#allocation5 + $0x48] sm:$0xff]  ;;  %p1907_p13 = por %p1906_p12, %p1905_p11 }
  0x24   :  { %119 = vmatpush1.msra.mxu0 %v72_v7  ;;  %v56_v23 = vld [vmem:[#allocation5 + $0x40] sm:$0xff]  ;;  %v1961_v24 = vld [vmem:[#allocation2 + $0x8] sm:$0xff]  ;;  %v55_v25 = vld [vmem:[#allocation5 + $0x38] sm:$0xff] }
  0x25   :  { %120 = vmatprep.subr.mxu0 %v71_v8  ;;  %176 = vmatprep.mubr.f32.mxu0 %v1961_v24  ;;  %v54_v26 = vld [vmem:[#allocation5 + $0x30] sm:$0xff]  ;;  %v53_v28 = vld [vmem:[#allocation5 + $0x28] sm:$0xff]  ;;  %v52_v29 = vld [vmem:[#allocation5 + $0x20] sm:$0xff]  ;;  %p1908_p0 = pnand %p1907_p13, %p1901_p10 }
  0x26   :  { %121 = vmatpush1.msra.mxu0 %v70_v9  ;;  %v1964_v27 = vld [vmem:[#allocation2 + $0x30] sm:$0xff]  ;;  %v1967_v30 = vld [vmem:[#allocation2 + $0x20] sm:$0xff]  ;;  %v51_v31 = vld [vmem:[#allocation5 + $0x18] sm:$0xff] }
  0x27   :  { %122 = vmatprep.subr.mxu0 %v69_v10  ;;  %1719 = vmatprep.subr.mxu1 %v1964_v27  ;;  %v50_v32 = vld [vmem:[#allocation5 + $0x10] sm:$0xff]  ;;  %v49_v34 = vld [vmem:[#allocation5 + $0x8] sm:$0xff]  ;;  %v48_v35 = vld [vmem:[#allocation5] sm:$0xff] }
  0x28   :  { %123 = vmatpush1.msra.mxu0 %v68_v11  ;;  %1720 = vmatpush3.msra.mxu1 %v1964_v27  ;;  %v1971_v33 = vld [vmem:[#allocation2 + $0x10] sm:$0xff]  ;;  %v1975_v36 = vld [vmem:[#allocation2] sm:$0xff]  ;;  %v111_v37 = vld [vmem:[#allocation5 + $0x1f8] sm:$0xff] }
  0x29   :  { %124 = vmatprep.subr.mxu0 %v67_v12  ;;  %1721 = vmatprep.subr.mxu1 %v1967_v30  ;;  %v110_v38 = vld [vmem:[#allocation5 + $0x1f0] sm:$0xff]  ;;  %v109_v39 = vld [vmem:[#allocation5 + $0x1e8] sm:$0xff]  ;;  %v108_v40 = vld [vmem:[#allocation5 + $0x1e0] sm:$0xff] }
  0x2a   :  { %125 = vmatpush1.msra.mxu0 %v66_v13  ;;  %1722 = vmatpush3.msra.mxu1 %v1967_v30  ;;  %v107_v41 = vld [vmem:[#allocation5 + $0x1d8] sm:$0xff]  ;;  %v106_v42 = vld [vmem:[#allocation5 + $0x1d0] sm:$0xff]  ;;  %v105_v43 = vld [vmem:[#allocation5 + $0x1c8] sm:$0xff] }
  0x2b   :  { %126 = vmatprep.subr.mxu0 %v65_v14  ;;  %1723 = vmatprep.subr.mxu1 %v1971_v33  ;;  %v104_v44 = vld [vmem:[#allocation5 + $0x1c0] sm:$0xff]  ;;  %v103_v45 = vld [vmem:[#allocation5 + $0x1b8] sm:$0xff]  ;;  %v102_v46 = vld [vmem:[#allocation5 + $0x1b0] sm:$0xff] }
  0x2c   :  { %127 = vmatpush1.msra.mxu0 %v64_v15  ;;  %1724 = vmatpush3.msra.mxu1 %v1971_v33  ;;  %v101_v47 = vld [vmem:[#allocation5 + $0x1a8] sm:$0xff]  ;;  %v100_v48 = vld [vmem:[#allocation5 + $0x1a0] sm:$0xff]  ;;  %v99_v49 = vld [vmem:[#allocation5 + $0x198] sm:$0xff] }
  0x2d   :  { %128 = vmatprep.subr.mxu0 %v63_v16  ;;  %1725 = vmatprep.subr.mxu1 %v1975_v36  ;;  %v98_v50 = vld [vmem:[#allocation5 + $0x190] sm:$0xff]  ;;  %v97_v51 = vld [vmem:[#allocation5 + $0x188] sm:$0xff]  ;;  %v96_v52 = vld [vmem:[#allocation5 + $0x180] sm:$0xff] }
  0x2e   :  { %129 = vmatpush1.msra.mxu0 %v62_v17  ;;  %1726 = vmatpush3.msra.mxu1 %v1975_v36  ;;  %v95_v53 = vld [vmem:[#allocation5 + $0x178] sm:$0xff]  ;;  %v94_v54 = vld [vmem:[#allocation5 + $0x170] sm:$0xff]  ;;  %v93_v55 = vld [vmem:[#allocation5 + $0x168] sm:$0xff] }
  0x2f   :  { %130 = vmatprep.subr.mxu0 %v61_v18  ;;  %v92_v56 = vld [vmem:[#allocation5 + $0x160] sm:$0xff]  ;;  %v91_v57 = vld [vmem:[#allocation5 + $0x158] sm:$0xff]  ;;  %v90_v58 = vld [vmem:[#allocation5 + $0x150] sm:$0xff]  ;;  %473 = vrot.lane.b32.xlu1 %v1964_v27, %s1930_s0 }
  0x30   :  { %131 = vmatpush1.msra.mxu0 %v60_v19  ;;  %v89_v59 = vld [vmem:[#allocation5 + $0x148] sm:$0xff]  ;;  %v88_v60 = vld [vmem:[#allocation5 + $0x140] sm:$0xff]  ;;  %v87_v61 = vld [vmem:[#allocation5 + $0x138] sm:$0xff] }
  0x31   :  { %132 = vmatprep.subr.mxu0 %v59_v20  ;;  %v86_v62 = vld [vmem:[#allocation5 + $0x130] sm:$0xff]  ;;  %v85_v63 = vld [vmem:[#allocation5 + $0x128] sm:$0xff]  ;;  %v84_v0 = vld [vmem:[#allocation5 + $0x120] sm:$0xff] }
  0x32   :  { %133 = vmatpush1.msra.mxu0 %v58_v21  ;;  %v83_v1 = vld [vmem:[#allocation5 + $0x118] sm:$0xff]  ;;  %v82_v2 = vld [vmem:[#allocation5 + $0x110] sm:$0xff]  ;;  %v81_v3 = vld [vmem:[#allocation5 + $0x108] sm:$0xff] }
  0x33   :  { %134 = vmatprep.subr.mxu0 %v57_v22  ;;  %v80_v4 = vld [vmem:[#allocation5 + $0x100] sm:$0xff]  ;;  %v1980_v5 = vld [vmem:[#allocation2 + $0x18] sm:$0xff]  ;;  %v1984_v6 = vld [vmem:[#allocation2 + $0x28] sm:$0xff]  ;;  %471 = vrot.lane.b32.xlu1 %v1967_v30, %s1930_s0 }
  0x34   :  { %135 = vmatpush1.msra.mxu0 %v56_v23  ;;  %v1988_v7 = vld [vmem:[#allocation2 + $0x38] sm:$0xff] }
  0x35   :  { %136 = vmatprep.subr.mxu0 %v55_v25  ;;  %1136 = vrot.lane.b32.xlu0 %v1988_v7, %s1930_s0 }
  0x36   :  { %137 = vmatpush1.msra.mxu0 %v54_v26 }
  0x37   :  { %138 = vmatprep.subr.mxu0 %v53_v28  ;;  %469 = vrot.lane.b32.xlu1 %v1971_v33, %s1930_s0 }
  0x38   :  { %139 = vmatpush1.msra.mxu0 %v52_v29 }
  0x39   :  { %140 = vmatprep.subr.mxu0 %v51_v31  ;;  %1132 = vrot.lane.b32.xlu0 %v1980_v5, %s1930_s0 }
  0x3a   :  { %141 = vmatpush1.msra.mxu0 %v50_v32 }
  0x3b   :  { %142 = vmatprep.subr.mxu0 %v49_v34  ;;  %467 = vrot.lane.b32.xlu1 %v1975_v36, %s1930_s0 }
  0x3c   :  { %143 = vmatpush1.msra.mxu0 %v48_v35 }
  0x3d   :  { %144 = vmatprep.subr.mxu0 %v111_v37  ;;  %1482 = vrot.lane.b32.xlu0 %v1988_v7, %s1932_s21 }
  0x3e   :  { %145 = vmatpush2.msra.mxu0 %v110_v38 }
  0x3f   :  { %146 = vmatprep.subr.mxu0 %v109_v39  ;;  %647 = vrot.lane.b32.xlu1 %v1964_v27, %s1931_s1 }
  0x40   :  { %147 = vmatpush2.msra.mxu0 %v108_v40 }
  0x41   :  { %148 = vmatprep.subr.mxu0 %v107_v41  ;;  %1478 = vrot.lane.b32.xlu0 %v1980_v5, %s1932_s21 }
  0x42   :  { %149 = vmatpush2.msra.mxu0 %v106_v42 }
  0x43   :  { %150 = vmatprep.subr.mxu0 %v105_v43  ;;  %645 = vrot.lane.b32.xlu1 %v1967_v30, %s1931_s1 }
  0x44   :  { %151 = vmatpush2.msra.mxu0 %v104_v44 }
  0x45   :  { %152 = vmatprep.subr.mxu0 %v103_v45  ;;  %1476 = vrot.lane.b32.xlu0 %v1961_v24, %s1932_s21 }
  0x46   :  { %153 = vmatpush2.msra.mxu0 %v102_v46 }
  0x47   :  { %154 = vmatprep.subr.mxu0 %v101_v47  ;;  %643 = vrot.lane.b32.xlu1 %v1971_v33, %s1931_s1 }
  0x48   :  { %155 = vmatpush2.msra.mxu0 %v100_v48 }
  0x49   :  { %156 = vmatprep.subr.mxu0 %v99_v49 }
  0x4a   :  { %157 = vmatpush2.msra.mxu0 %v98_v50 }
  0x4b   :  { %158 = vmatprep.subr.mxu0 %v97_v51  ;;  %641 = vrot.lane.b32.xlu1 %v1975_v36, %s1931_s1 }
  0x4c   :  { %159 = vmatpush2.msra.mxu0 %v96_v52 }
  0x4d   :  { %160 = vmatprep.subr.mxu0 %v95_v53 }
  0x4e   :  { %161 = vmatpush2.msra.mxu0 %v94_v54 }
  0x4f   :  { %162 = vmatprep.subr.mxu0 %v93_v55  ;;  %821 = vrot.lane.b32.xlu1 %v1964_v27, %s1932_s21 }
  0x50   :  { %163 = vmatpush2.msra.mxu0 %v92_v56 }
  0x51   :  { %164 = vmatprep.subr.mxu0 %v91_v57 }
  0x52   :  { %165 = vmatpush2.msra.mxu0 %v90_v58 }
  0x53   :  { %166 = vmatprep.subr.mxu0 %v89_v59  ;;  %819 = vrot.lane.b32.xlu1 %v1967_v30, %s1932_s21 }
  0x54   :  { %167 = vmatpush2.msra.mxu0 %v88_v60 }
  0x55   :  { %168 = vmatprep.subr.mxu0 %v87_v61 }
  0x56   :  { %169 = vmatpush2.msra.mxu0 %v86_v62 }
  0x57   :  { %170 = vmatprep.subr.mxu0 %v85_v63  ;;  %817 = vrot.lane.b32.xlu1 %v1971_v33, %s1932_s21 }
  0x58   :  { %171 = vmatpush2.msra.mxu0 %v84_v0 }
  0x59   :  { %172 = vmatprep.subr.mxu0 %v83_v1 }
  0x5a   :  { %173 = vmatpush2.msra.mxu0 %v82_v2 }
  0x5b   :  { %174 = vmatprep.subr.mxu0 %v81_v3  ;;  %815 = vrot.lane.b32.xlu1 %v1975_v36, %s1932_s21 }
  0x5c   :  { %175 = vmatpush2.msra.mxu0 %v80_v4 }
  0x5d   :  { %177 = vmatmul.mubr.f32.vlgmr.msra.gmra.mxu0 %v1975_v36 }
  0x5e   :  { %182 = vmatprep.mubr.f32.mxu0 %v1980_v5 }
  0x5f   :  { %1134 = vrot.lane.b32.xlu1 %v1984_v6, %s1930_s0 }
  0x61   :  { %183 = vmatmul.mubr.f32.gmra.mxu0 %v1971_v33 }
  0x62   :  { %188 = vmatprep.mubr.f32.mxu0 %v1984_v6 }
  0x63   :  { %1130 = vrot.lane.b32.xlu1 %v1961_v24, %s1930_s0 }
  0x65   :  { %189 = vmatmul.mubr.f32.gmra.mxu0 %v1967_v30 }
  0x66   :  { %194 = vmatprep.mubr.f32.mxu0 %v1988_v7 }
  0x67   :  { %1309 = vrot.lane.b32.xlu1 %v1988_v7, %s1931_s1 }
  0x69   :  { %195 = vmatmul.mubr.f32.gmra.mxu0 %v1964_v27 }
  0x6b   :  { %1307 = vrot.lane.b32.xlu1 %v1984_v6, %s1931_s1 }
  0x6f   :  { %1305 = vrot.lane.b32.xlu1 %v1980_v5, %s1931_s1 }
  0x73   :  { %1303 = vrot.lane.b32.xlu1 %v1961_v24, %s1931_s1 }
  0x77   :  { %1480 = vrot.lane.b32.xlu1 %v1984_v6, %s1932_s21 }
  0xa1   :  { %v2041_v8 = vpop.permute.xlu1 %473 }
  0xa2   :  { %1733 = vmatprep.subr.mxu1 %v2041_v8 }
 0x11d   :  { %v178_v9 = vpop.f32.mrf.mxu0 }
 0x11e   :  { %v201_v16 = vmul.f32 0.032258064, %v178_v9 }
 0x11f   :  { %v180_v10 = vpop.f32.mrf.mxu0 }
 0x120   :  { %v202_v21 = vmul.f32 0.032258064, %v180_v10 }
 0x121   :  { %v184_v11 = vpop.f32.mrf.mxu0 }
 0x122   :  { %v203_v18 = vmul.f32 0.032258064, %v184_v11 }
 0x123   :  { %v186_v12 = vpop.f32.mrf.mxu0 }
 0x124   :  { %v204_v23 = vmul.f32 0.032258064, %v186_v12 }
 0x125   :  { %v190_v13 = vpop.f32.mrf.mxu0 }
 0x126   :  { %v205_v15 = vmul.f32 0.032258064, %v190_v13 }
 0x127   :  { %v192_v14 = vpop.f32.mrf.mxu0 }
 0x128   :  { %v206_v19 = vmul.f32 0.032258064, %v192_v14  ;;  %v209_v25 = vmax.f32 %v201_v16, %v205_v15 }
 0x129   :  { %v196_v17 = vpop.f32.mrf.mxu0 }
 0x12a   :  { %v207_v20 = vmul.f32 0.032258064, %v196_v17  ;;  %v218_v28 = vmax.f32 %v202_v21, %v206_v19 }
 0x12b   :  { %v198_v22 = vpop.f32.mrf.mxu0 }
 0x12c   :  { %v210_v26 = vmax.f32 %v203_v18, %v207_v20  ;;  %v208_v27 = vmul.f32 0.032258064, %v198_v22 }
 0x12e   :  { %v211_v29 = vmax.f32 %v209_v25, %v210_v26  ;;  %v219_v30 = vmax.f32 %v204_v23, %v208_v27 }
 0x130   :  { %v212_v31 = vrot.slane %v211_v29, 4  ;;  %v220_v32 = vmax.f32 %v218_v28, %v219_v30 }
 0x132   :  { %v213_v33 = vmax.f32 %v211_v29, %v212_v31  ;;  %v221_v34 = vrot.slane %v220_v32, 4 }
 0x134   :  { %v214_v35 = vrot.slane %v213_v33, 2  ;;  %v222_v36 = vmax.f32 %v220_v32, %v221_v34  ;;  %v2053_v34 = vpop.permute.xlu1 %471 }
 0x136   :  { %v215_v37 = vmax.f32 %v213_v33, %v214_v35  ;;  %v223_v38 = vrot.slane %v222_v36, 2 }
 0x138   :  { %v216_v39 = vrot.slane %v215_v37, 1  ;;  %v224_v40 = vmax.f32 %v222_v36, %v223_v38 }
 0x13a   :  { %v217_v41 = vmax.f32 %v215_v37, %v216_v39  ;;  %v225_v42 = vrot.slane %v224_v40, 1  ;;  %v2063_v37 = vpop.permute.xlu1 %469 }
 0x13c   :  { %v227_v43 = vsub.f32 %v201_v16, %v217_v41  ;;  %v229_v44 = vsub.f32 %v203_v18, %v217_v41  ;;  %v231_v45 = vsub.f32 %v205_v15, %v217_v41  ;;  %v233_v46 = vsub.f32 %v207_v20, %v217_v41 }
 0x13d   :  { %v226_v47 = vmax.f32 %v224_v40, %v225_v42 }
 0x13e   :  { %v235_v48 = vmul.f32 1.442695, %v227_v43  ;;  %v239_v49 = vmul.f32 1.442695, %v229_v44  ;;  %v243_v50 = vmul.f32 1.442695, %v231_v45  ;;  %v2070_v39 = vpop.permute.xlu1 %467 }
 0x13f   :  { %v247_v51 = vmul.f32 1.442695, %v233_v46  ;;  %v228_v52 = vsub.f32 %v202_v21, %v226_v47  ;;  %v230_v53 = vsub.f32 %v204_v23, %v226_v47  ;;  %v232_v54 = vsub.f32 %v206_v19, %v226_v47 }
 0x140   :  { %1840 = vpow2.f32 %v235_v48  ;;  %v234_v55 = vsub.f32 %v208_v27, %v226_v47 }
 0x141   :  { %1842 = vpow2.f32 %v239_v49  ;;  %v237_v56 = vmul.f32 1.442695, %v228_v52  ;;  %v241_v57 = vmul.f32 1.442695, %v230_v53  ;;  %v245_v58 = vmul.f32 1.442695, %v232_v54 }
 0x142   :  { %1844 = vpow2.f32 %v243_v50  ;;  %v249_v59 = vmul.f32 1.442695, %v234_v55  ;;  %v2078_v40 = vpop.permute.xlu1 %647  ;;  %v2114_v50 = vpop.permute.xlu0 %1136 }
 0x143   :  { %1846 = vpow2.f32 %v247_v51 }
 0x144   :  { %1848 = vpow2.f32 %v237_v56 }
 0x145   :  { %1850 = vpow2.f32 %v241_v57 }
 0x146   :  { %1852 = vpow2.f32 %v245_v58  ;;  %v2083_v41 = vpop.permute.xlu1 %645  ;;  %v2118_v52 = vpop.permute.xlu0 %1132 }
 0x147   :  { %1854 = vpow2.f32 %v249_v59 }
 0x14a   :  { %v2089_v42 = vpop.permute.xlu1 %643  ;;  %v2122_v54 = vpop.permute.xlu0 %1482 }
 0x14d   :  { %v1841_v60 = vpop.eup %1840 }
 0x14e   :  { %v1843_v61 = vpop.eup %1842  ;;  %v2092_v43 = vpop.permute.xlu1 %641 }
 0x14f   :  { %v1845_v62 = vpop.eup %1844  ;;  %v251_v63 = vadd.f32 %v1843_v61, %v1841_v60  ;;  %v2126_v56 = vpop.permute.xlu0 %1478 }
 0x150   :  { %v1847_v0 = vpop.eup %1846 }
 0x151   :  { %v1849_v1 = vpop.eup %1848  ;;  %v252_v2 = vadd.f32 %v1845_v62, %v251_v63 }
 0x152   :  { %v1851_v3 = vpop.eup %1850  ;;  %v2098_v44 = vpop.permute.xlu1 %821 }
 0x153   :  { %v253_v4 = vadd.f32 %v1847_v0, %v252_v2  ;;  %v260_v9 = vadd.f32 %v1851_v3, %v1849_v1  ;;  %v1853_v10 = vpop.eup %1852  ;;  %v2130_v58 = vpop.permute.xlu0 %1476 }
 0x154   :  { %v1855_v13 = vpop.eup %1854 }
 0x155   :  { %v254_v11 = vrot.slane %v253_v4, 4  ;;  %v261_v12 = vadd.f32 %v1853_v10, %v260_v9 }
 0x156   :  { %v2102_v45 = vpop.permute.xlu1 %819 }
 0x157   :  { %v255_v14 = vadd.f32 %v254_v11, %v253_v4  ;;  %v262_v15 = vadd.f32 %v1855_v13, %v261_v12 }
 0x159   :  { %v256_v16 = vrot.slane %v255_v14, 2  ;;  %v263_v17 = vrot.slane %v262_v15, 4 }
 0x15a   :  { %v2106_v46 = vpop.permute.xlu1 %817 }
 0x15b   :  { %v257_v18 = vadd.f32 %v256_v16, %v255_v14  ;;  %v264_v19 = vadd.f32 %v263_v17, %v262_v15 }
 0x15d   :  { %v258_v20 = vrot.slane %v257_v18, 1  ;;  %v265_v21 = vrot.slane %v264_v19, 2 }
 0x15e   :  { %v2108_v47 = vpop.permute.xlu1 %815 }
 0x15f   :  { %v259_v22 = vadd.f32 %v258_v20, %v257_v18  ;;  %v266_v23 = vadd.f32 %v265_v21, %v264_v19 }
 0x161   :  { %1856 = vrcp.f32 %v259_v22  ;;  %v267_v25 = vrot.slane %v266_v23, 1 }
 0x162   :  { %v2110_v48 = vpop.permute.xlu1 %1134 }
 0x163   :  { %v268_v26 = vadd.f32 %v267_v25, %v266_v23 }
 0x165   :  { %1858 = vrcp.f32 %v268_v26 }
 0x166   :  { %v2112_v49 = vpop.permute.xlu1 %1130 }
 0x16a   :  { %v2116_v51 = vpop.permute.xlu1 %1309 }
 0x16e   :  { %v1857_v27 = vpop.eup %1856  ;;  %v2120_v53 = vpop.permute.xlu1 %1307 }
 0x16f   :  { %v273_v28 = vmul.f32 %v1857_v27, %v1841_v60  ;;  %v275_v30 = vmul.f32 %v1857_v27, %v1843_v61  ;;  %v277_v32 = vmul.f32 %v1857_v27, %v1845_v62  ;;  %v279_v35 = vmul.f32 %v1857_v27, %v1847_v0 }
 0x171   :  { %771 = vrot.lane.b32.xlu0 %v273_v28, %s1932_s21  ;;  %419 = vrot.lane.b32.xlu1 %v273_v28, %s1930_s0 }
 0x172   :  { %v1859_v29 = vpop.eup %1858  ;;  %v2124_v55 = vpop.permute.xlu1 %1305 }
 0x173   :  { %v2046_v31 = vmul.f32 %v1859_v29, %v1849_v1  ;;  %v2051_v33 = vmul.f32 %v1859_v29, %v1851_v3  ;;  %v2058_v36 = vmul.f32 %v1859_v29, %v1853_v10  ;;  %v2065_v38 = vmul.f32 %v1859_v29, %v1855_v13 }
 0x175   :  { %421 = vrot.lane.b32.xlu1 %v275_v30, %s1930_s0  ;;  %1259 = vrot.lane.b32.xlu0 %v2046_v31, %s1931_s1 }
 0x176   :  { %v2128_v57 = vpop.permute.xlu1 %1303 }
 0x179   :  { %423 = vrot.lane.b32.xlu1 %v277_v32, %s1930_s0  ;;  %1261 = vrot.lane.b32.xlu0 %v2051_v33, %s1931_s1 }
 0x17a   :  { %v2132_v59 = vpop.permute.xlu1 %1480 }
 0x17d   :  { %425 = vrot.lane.b32.xlu1 %v279_v35, %s1930_s0  ;;  %1263 = vrot.lane.b32.xlu0 %v2058_v36, %s1931_s1 }
 0x181   :  { %597 = vrot.lane.b32.xlu1 %v273_v28, %s1931_s1  ;;  %1265 = vrot.lane.b32.xlu0 %v2065_v38, %s1931_s1 }
 0x185   :  { %599 = vrot.lane.b32.xlu1 %v275_v30, %s1931_s1  ;;  %1432 = vrot.lane.b32.xlu0 %v2046_v31, %s1932_s21 }
 0x189   :  { %601 = vrot.lane.b32.xlu1 %v277_v32, %s1931_s1  ;;  %1434 = vrot.lane.b32.xlu0 %v2051_v33, %s1932_s21 }
 0x18d   :  { %603 = vrot.lane.b32.xlu1 %v279_v35, %s1931_s1  ;;  %1436 = vrot.lane.b32.xlu0 %v2058_v36, %s1932_s21 }
 0x191   :  { %773 = vrot.lane.b32.xlu1 %v275_v30, %s1932_s21  ;;  %1438 = vrot.lane.b32.xlu0 %v2065_v38, %s1932_s21 }
 0x195   :  { %775 = vrot.lane.b32.xlu1 %v277_v32, %s1932_s21 }
 0x199   :  { %777 = vrot.lane.b32.xlu1 %v279_v35, %s1932_s21 }
 0x19d   :  { %1082 = vrot.lane.b32.xlu1 %v2046_v31, %s1930_s0 }
 0x1a1   :  { %1084 = vrot.lane.b32.xlu1 %v2051_v33, %s1930_s0 }
 0x1a5   :  { %1086 = vrot.lane.b32.xlu1 %v2058_v36, %s1930_s0 }
 0x1a9   :  { %1088 = vrot.lane.b32.xlu1 %v2065_v38, %s1930_s0 }
 0x1af   :  { %281 = vxpose.xlu0.b32.start [1/4] (short) (narrow) %v273_v28, 32 }
 0x1b3   :  { %282 = vxpose.xlu0.b32.cont [2/4] (short) (narrow) %v275_v30, 32 }
 0x1b7   :  { %283 = vxpose.xlu0.b32.cont [3/4] (short) (narrow) %v277_v32, 32 }
 0x1bb   :  { %284 = vxpose.xlu0.b32.end [4/4] (short) (narrow) %v279_v35, 32 }
 0x1e3   :  { %v772_v60 = vpop.permute.xlu0 %771  ;;  %v420_v61 = vpop.permute.xlu1 %419 }
 0x1e4   :  { %431 = vxpose.xlu0.b32.start [1/4] (short) (narrow) %v420_v61, 32  ;;  %783 = vxpose.xlu1.b32.start [1/4] (short) (narrow) %v772_v60, 32 }
 0x1e7   :  { %v422_v62 = vpop.permute.xlu1 %421  ;;  %v1260_v4 = vpop.permute.xlu0 %1259 }
 0x1e8   :  { %432 = vxpose.xlu0.b32.cont [2/4] (short) (narrow) %v422_v62, 32 }
 0x1eb   :  { %v424_v63 = vpop.permute.xlu1 %423  ;;  %v1262_v10 = vpop.permute.xlu0 %1261 }
 0x1ec   :  { %433 = vxpose.xlu0.b32.cont [3/4] (short) (narrow) %v424_v63, 32 }
 0x1ef   :  { %v426_v0 = vpop.permute.xlu1 %425  ;;  %v1264_v13 = vpop.permute.xlu0 %1263 }
 0x1f0   :  { %434 = vxpose.xlu0.b32.end [4/4] (short) (narrow) %v426_v0, 32 }
 0x1f3   :  { %v598_v1 = vpop.permute.xlu1 %597  ;;  %v1266_v15 = vpop.permute.xlu0 %1265 }
 0x1f4   :  { %609 = vxpose.xlu0.b32.start [1/4] (short) (narrow) %v598_v1, 32 }
 0x1f7   :  { %v600_v2 = vpop.permute.xlu1 %599  ;;  %v1433_v18 = vpop.permute.xlu0 %1432 }
 0x1f8   :  { %610 = vxpose.xlu0.b32.cont [2/4] (short) (narrow) %v600_v2, 32 }
 0x1fb   :  { %v602_v3 = vpop.permute.xlu1 %601  ;;  %v1435_v20 = vpop.permute.xlu0 %1434 }
 0x1fc   :  { %611 = vxpose.xlu0.b32.cont [3/4] (short) (narrow) %v602_v3, 32 }
 0x1ff   :  { %v604_v9 = vpop.permute.xlu1 %603  ;;  %v1437_v22 = vpop.permute.xlu0 %1436 }
 0x200   :  { %612 = vxpose.xlu0.b32.end [4/4] (short) (narrow) %v604_v9, 32 }
 0x203   :  { %v774_v11 = vpop.permute.xlu1 %773  ;;  %v1439_v23 = vpop.permute.xlu0 %1438 }
 0x204   :  { %945 = vxpose.xlu0.b32.start [1/4] (short) (narrow) %v2046_v31, 32  ;;  %784 = vxpose.xlu1.b32.cont [2/4] (short) (narrow) %v774_v11, 32 }
 0x207   :  { %v776_v12 = vpop.permute.xlu1 %775 }
 0x208   :  { %946 = vxpose.xlu0.b32.cont [2/4] (short) (narrow) %v2051_v33, 32  ;;  %785 = vxpose.xlu1.b32.cont [3/4] (short) (narrow) %v776_v12, 32 }
 0x20b   :  { %v778_v14 = vpop.permute.xlu1 %777 }
 0x20c   :  { %947 = vxpose.xlu0.b32.cont [3/4] (short) (narrow) %v2058_v36, 32  ;;  %786 = vxpose.xlu1.b32.end [4/4] (short) (narrow) %v778_v14, 32 }
 0x20f   :  { %v1083_v16 = vpop.permute.xlu1 %1082 }
 0x210   :  { %948 = vxpose.xlu0.b32.end [4/4] (short) (narrow) %v2065_v38, 32  ;;  %1094 = vxpose.xlu1.b32.start [1/4] (short) (narrow) %v1083_v16, 32 }
 0x213   :  { %v1085_v17 = vpop.permute.xlu1 %1084 }
 0x214   :  { %1271 = vxpose.xlu0.b32.start [1/4] (short) (narrow) %v1260_v4, 32  ;;  %1095 = vxpose.xlu1.b32.cont [2/4] (short) (narrow) %v1085_v17, 32 }
 0x217   :  { %v1087_v19 = vpop.permute.xlu1 %1086 }
 0x218   :  { %1272 = vxpose.xlu0.b32.cont [2/4] (short) (narrow) %v1262_v10, 32  ;;  %1096 = vxpose.xlu1.b32.cont [3/4] (short) (narrow) %v1087_v19, 32 }
 0x21b   :  { %v1089_v21 = vpop.permute.xlu1 %1088 }
 0x21c   :  { %1273 = vxpose.xlu0.b32.cont [3/4] (short) (narrow) %v1264_v13, 32  ;;  %1097 = vxpose.xlu1.b32.end [4/4] (short) (narrow) %v1089_v21, 32 }
 0x220   :  { %1274 = vxpose.xlu0.b32.end [4/4] (short) (narrow) %v1266_v15, 32 }
 0x224   :  { %1444 = vxpose.xlu0.b32.start [1/4] (short) (narrow) %v1433_v18, 32 }
 0x228   :  { %1445 = vxpose.xlu0.b32.cont [2/4] (short) (narrow) %v1435_v20, 32 }
 0x22b   :  { %v297_v25 = vpop.trf.xlu0 }
 0x22c   :  { %1446 = vxpose.xlu0.b32.cont [3/4] (short) (narrow) %v1437_v22, 32  ;;  %1727 = vmatprep.mubr.msk.f32.mxu1 %vm313_vm0, %v297_v25 }
 0x22f   :  { %v298_v26 = vpop.trf.xlu0 }
 0x230   :  { %1447 = vxpose.xlu0.b32.end [4/4] (short) (narrow) %v1439_v23, 32  ;;  %1728 = vmatmul.mubr.msk.f32.vlgmr.msra.gmra.mxu1 %vm313_vm0, %v298_v26 }
 0x231   :  { %1734 = vmatpush3.msra.mxu1 %v2041_v8 }
 0x232   :  { %1735 = vmatprep.subr.mxu1 %v2053_v34 }
 0x233   :  { %1736 = vmatpush3.msra.mxu1 %v2053_v34  ;;  %v299_v27 = vpop.trf.xlu0 }
 0x234   :  { %1737 = vmatprep.subr.mxu1 %v2063_v37  ;;  %1730 = vmatprep.mubr.msk.f32.mxu1 %vm313_vm0, %v299_v27 }
 0x235   :  { %1738 = vmatpush3.msra.mxu1 %v2063_v37 }
 0x236   :  { %1739 = vmatprep.subr.mxu1 %v2070_v39 }
 0x237   :  { %1740 = vmatpush3.msra.mxu1 %v2070_v39  ;;  %v300_v28 = vpop.trf.xlu0 }
 0x238   :  { %1747 = vmatprep.subr.mxu1 %v2078_v40  ;;  %1731 = vmatmul.mubr.msk.f32.gmra.mxu1 %vm313_vm0, %v300_v28 }
 0x260   :  { %v447_v8 = vpop.trf.xlu0 }
 0x261   :  { %1741 = vmatprep.mubr.msk.f32.mxu1 %vm313_vm0, %v447_v8 }
 0x264   :  { %v448_v29 = vpop.trf.xlu0 }
 0x265   :  { %1742 = vmatmul.mubr.msk.f32.vlgmr.msra.gmra.mxu1 %vm313_vm0, %v448_v29 }
 0x266   :  { %1748 = vmatpush3.msra.mxu1 %v2078_v40 }
 0x267   :  { %1749 = vmatprep.subr.mxu1 %v2083_v41 }
 0x268   :  { %1750 = vmatpush3.msra.mxu1 %v2083_v41  ;;  %v449_v30 = vpop.trf.xlu0 }
 0x269   :  { %1751 = vmatprep.subr.mxu1 %v2089_v42  ;;  %1744 = vmatprep.mubr.msk.f32.mxu1 %vm313_vm0, %v449_v30 }
 0x26a   :  { %1752 = vmatpush3.msra.mxu1 %v2089_v42 }
 0x26b   :  { %1753 = vmatprep.subr.mxu1 %v2092_v43 }
 0x26c   :  { %1754 = vmatpush3.msra.mxu1 %v2092_v43  ;;  %v450_v31 = vpop.trf.xlu0 }
 0x26d   :  { %1761 = vmatprep.subr.mxu1 %v2098_v44  ;;  %1745 = vmatmul.mubr.msk.f32.gmra.mxu1 %vm313_vm0, %v450_v31 }
 0x270   :  { %v625_v32 = vpop.trf.xlu0 }
 0x271   :  { %1755 = vmatprep.mubr.msk.f32.mxu1 %vm313_vm0, %v625_v32 }
 0x274   :  { %v626_v33 = vpop.trf.xlu0 }
 0x275   :  { %1756 = vmatmul.mubr.msk.f32.vlgmr.msra.gmra.mxu1 %vm313_vm0, %v626_v33 }
 0x276   :  { %1762 = vmatpush3.msra.mxu1 %v2098_v44 }
 0x277   :  { %1763 = vmatprep.subr.mxu1 %v2102_v45 }
 0x278   :  { %1764 = vmatpush3.msra.mxu1 %v2102_v45  ;;  %v627_v34 = vpop.trf.xlu0 }
 0x279   :  { %1765 = vmatprep.subr.mxu1 %v2106_v46  ;;  %1758 = vmatprep.mubr.msk.f32.mxu1 %vm313_vm0, %v627_v34 }
 0x27a   :  { %1766 = vmatpush3.msra.mxu1 %v2106_v46 }
 0x27b   :  { %1767 = vmatprep.subr.mxu1 %v2108_v47 }
 0x27c   :  { %1768 = vmatpush3.msra.mxu1 %v2108_v47  ;;  %v628_v35 = vpop.trf.xlu0  ;;  %v799_v36 = vpop.trf.xlu1 }
 0x27d   :  { %1759 = vmatmul.mubr.msk.f32.gmra.mxu1 %vm313_vm0, %v628_v35  ;;  %1775 = vmatprep.subr.mxu1 %v1988_v7 }
 0x27e   :  { %1769 = vmatprep.mubr.msk.f32.mxu1 %vm313_vm0, %v799_v36 }
 0x280   :  { %v961_v37 = vpop.trf.xlu0  ;;  %v800_v38 = vpop.trf.xlu1 }
 0x281   :  { %1770 = vmatmul.mubr.msk.f32.vlgmr.msra.gmra.mxu1 %vm313_vm0, %v800_v38 }
 0x282   :  { %1776 = vmatpush3.msra.mxu1 %v1988_v7 }
 0x283   :  { %1777 = vmatprep.subr.mxu1 %v1984_v6 }
 0x284   :  { %1778 = vmatpush3.msra.mxu1 %v1984_v6  ;;  %v962_v39 = vpop.trf.xlu0  ;;  %v801_v40 = vpop.trf.xlu1 }
 0x285   :  { %1779 = vmatprep.subr.mxu1 %v1980_v5  ;;  %1772 = vmatprep.mubr.msk.f32.mxu1 %vm313_vm0, %v801_v40 }
 0x286   :  { %1780 = vmatpush3.msra.mxu1 %v1980_v5 }
 0x287   :  { %1781 = vmatprep.subr.mxu1 %v1961_v24 }
 0x288   :  { %1782 = vmatpush3.msra.mxu1 %v1961_v24  ;;  %v963_v41 = vpop.trf.xlu0  ;;  %v802_v42 = vpop.trf.xlu1 }
 0x289   :  { %1789 = vmatprep.subr.mxu1 %v2114_v50  ;;  %1773 = vmatmul.mubr.msk.f32.gmra.mxu1 %vm313_vm0, %v802_v42 }
 0x28a   :  { %1783 = vmatprep.mubr.msk.f32.mxu1 %vm313_vm0, %v961_v37 }
 0x28c   :  { %v964_v6 = vpop.trf.xlu0  ;;  %v1110_v7 = vpop.trf.xlu1 }
 0x28d   :  { %1784 = vmatmul.mubr.msk.f32.vlgmr.msra.gmra.mxu1 %vm313_vm0, %v962_v39 }
 0x28e   :  { %1790 = vmatpush3.msra.mxu1 %v2114_v50  ;;  %1786 = vmatprep.mubr.msk.f32.mxu1 %vm313_vm0, %v963_v41 }
 0x28f   :  { %1791 = vmatprep.subr.mxu1 %v2110_v48 }
 0x290   :  { %1792 = vmatpush3.msra.mxu1 %v2110_v48  ;;  %v1287_v24 = vpop.trf.xlu0  ;;  %v1111_v5 = vpop.trf.xlu1 }
 0x291   :  { %1793 = vmatprep.subr.mxu1 %v2118_v52  ;;  %1787 = vmatmul.mubr.msk.f32.gmra.mxu1 %vm313_vm0, %v964_v6 }
 0x292   :  { %1794 = vmatpush3.msra.mxu1 %v2118_v52  ;;  %1797 = vmatprep.mubr.msk.f32.mxu1 %vm313_vm0, %v1110_v7 }
 0x293   :  { %1795 = vmatprep.subr.mxu1 %v2112_v49 }
 0x294   :  { %1796 = vmatpush3.msra.mxu1 %v2112_v49  ;;  %v1288_v43 = vpop.trf.xlu0  ;;  %v1112_v44 = vpop.trf.xlu1 }
 0x295   :  { %1803 = vmatprep.subr.mxu1 %v2116_v51  ;;  %1798 = vmatmul.mubr.msk.f32.vlgmr.msra.gmra.mxu1 %vm313_vm0, %v1111_v5 }
 0x296   :  { %1804 = vmatpush3.msra.mxu1 %v2116_v51  ;;  %1800 = vmatprep.mubr.msk.f32.mxu1 %vm313_vm0, %v1112_v44 }
 0x297   :  { %1805 = vmatprep.subr.mxu1 %v2120_v53 }
 0x298   :  { %1806 = vmatpush3.msra.mxu1 %v2120_v53  ;;  %v1289_v45 = vpop.trf.xlu0  ;;  %v1113_v46 = vpop.trf.xlu1 }
 0x299   :  { %1807 = vmatprep.subr.mxu1 %v2124_v55  ;;  %1801 = vmatmul.mubr.msk.f32.gmra.mxu1 %vm313_vm0, %v1113_v46 }
 0x29a   :  { %1808 = vmatpush3.msra.mxu1 %v2124_v55  ;;  %1811 = vmatprep.mubr.msk.f32.mxu1 %vm313_vm0, %v1287_v24 }
 0x29b   :  { %1809 = vmatprep.subr.mxu1 %v2128_v57 }
 0x29c   :  { %1810 = vmatpush3.msra.mxu1 %v2128_v57  ;;  %v1290_v47 = vpop.trf.xlu0 }
 0x29d   :  { %1817 = vmatprep.subr.mxu1 %v2122_v54  ;;  %1812 = vmatmul.mubr.msk.f32.vlgmr.msra.gmra.mxu1 %vm313_vm0, %v1288_v43 }
 0x29e   :  { %1818 = vmatpush3.msra.mxu1 %v2122_v54  ;;  %1814 = vmatprep.mubr.msk.f32.mxu1 %vm313_vm0, %v1289_v45 }
 0x29f   :  { %1819 = vmatprep.subr.mxu1 %v2132_v59 }
 0x2a0   :  { %1820 = vmatpush3.msra.mxu1 %v2132_v59  ;;  %v1460_v48 = vpop.trf.xlu0 }
 0x2a1   :  { %1821 = vmatprep.subr.mxu1 %v2126_v56  ;;  %1815 = vmatmul.mubr.msk.f32.gmra.mxu1 %vm313_vm0, %v1290_v47 }
 0x2a2   :  { %1822 = vmatpush3.msra.mxu1 %v2126_v56  ;;  %1825 = vmatprep.mubr.msk.f32.mxu1 %vm313_vm0, %v1460_v48 }
 0x2a3   :  { %1823 = vmatprep.subr.mxu1 %v2130_v58 }
 0x2a4   :  { %1824 = vmatpush3.msra.mxu1 %v2130_v58  ;;  %v1461_v49 = vpop.trf.xlu0 }
 0x2a5   :  { %1826 = vmatmul.mubr.msk.f32.vlgmr.msra.gmra.mxu1 %vm313_vm0, %v1461_v49 }
 0x2a8   :  { %v1462_v50 = vpop.trf.xlu0 }
 0x2a9   :  { %1828 = vmatprep.mubr.msk.f32.mxu1 %vm313_vm0, %v1462_v50 }
 0x2ac   :  { %v1463_v51 = vpop.trf.xlu0 }
 0x2ad   :  { %1829 = vmatmul.mubr.msk.f32.gmra.mxu1 %vm313_vm0, %v1463_v51 }
 0x2f0   :  { %v1729_v52 = vpop.f32.mrf.mxu1 }
 0x2f1   :  { %412 = vst.msk [vmem:[#allocation7 + $0x10] sm:$0xff] %vm313_vm0, %v1729_v52 }
 0x2f2   :  { %v392_v53 = vpop.f32.mrf.mxu1 }
 0x2f3   :  { %411 = vst.msk [vmem:[#allocation7] sm:$0xff] %vm313_vm0, %v392_v53 }
 0x2f8   :  { %v1732_v54 = vpop.f32.mrf.mxu1 }
 0x2f9   :  { %414 = vst.msk [vmem:[#allocation7 + $0x30] sm:$0xff] %vm313_vm0, %v1732_v54 }
 0x2fa   :  { %v402_v55 = vpop.f32.mrf.mxu1 }
 0x2fb   :  { %413 = vst.msk [vmem:[#allocation7 + $0x20] sm:$0xff] %vm313_vm0, %v402_v55 }
 0x325   :  { %v1743_v56 = vpop.f32.mrf.mxu1 }
 0x326   :  { %582 = vrot.lane.b32.xlu0 %v1743_v56, %s1932_s21 }
 0x327   :  { %v557_v57 = vpop.f32.mrf.mxu1 }
 0x328   :  { %580 = vrot.lane.b32.xlu1 %v557_v57, %s1932_s21 }
 0x32d   :  { %v1746_v58 = vpop.f32.mrf.mxu1 }
 0x32e   :  { %586 = vrot.lane.b32.xlu1 %v1746_v58, %s1932_s21 }
 0x32f   :  { %v567_v59 = vpop.f32.mrf.mxu1 }
 0x332   :  { %584 = vrot.lane.b32.xlu1 %v567_v59, %s1932_s21 }
 0x335   :  { %v1757_v60 = vpop.f32.mrf.mxu1 }
 0x336   :  { %756 = vrot.lane.b32.xlu1 %v1757_v60, %s1931_s1 }
 0x337   :  { %v731_v61 = vpop.f32.mrf.mxu1 }
 0x33a   :  { %754 = vrot.lane.b32.xlu1 %v731_v61, %s1931_s1 }
 0x33d   :  { %v1760_v62 = vpop.f32.mrf.mxu1 }
 0x33e   :  { %760 = vrot.lane.b32.xlu1 %v1760_v62, %s1931_s1 }
 0x33f   :  { %v741_v63 = vpop.f32.mrf.mxu1 }
 0x341   :  { %v1771_v0 = vpop.f32.mrf.mxu1 }
 0x342   :  { %758 = vrot.lane.b32.xlu1 %v741_v63, %s1931_s1 }
 0x343   :  { %v905_v1 = vpop.f32.mrf.mxu1 }
 0x344   :  { %928 = vrot.lane.b32.xlu0 %v905_v1, %s1930_s0 }
 0x346   :  { %930 = vrot.lane.b32.xlu1 %v1771_v0, %s1930_s0 }
 0x349   :  { %v1774_v2 = vpop.f32.mrf.mxu1 }
 0x34a   :  { %934 = vrot.lane.b32.xlu1 %v1774_v2, %s1930_s0 }
 0x34b   :  { %v915_v3 = vpop.f32.mrf.mxu1 }
 0x34c   :  { %932 = vrot.lane.b32.xlu0 %v915_v3, %s1930_s0 }
 0x34d   :  { %v1785_v4 = vpop.f32.mrf.mxu1 }
 0x34e   :  { %1075 = vst.msk [vmem:[#allocation7 + $0x18] sm:$0xff] %vm313_vm0, %v1785_v4 }
 0x34f   :  { %v1055_v9 = vpop.f32.mrf.mxu1 }
 0x350   :  { %1074 = vst.msk [vmem:[#allocation7 + $0x8] sm:$0xff] %vm313_vm0, %v1055_v9 }
 0x351   :  { %v1788_v10 = vpop.f32.mrf.mxu1 }
 0x352   :  { %1077 = vst.msk [vmem:[#allocation7 + $0x38] sm:$0xff] %vm313_vm0, %v1788_v10 }
 0x353   :  { %v1065_v11 = vpop.f32.mrf.mxu1 }
 0x354   :  { %1076 = vst.msk [vmem:[#allocation7 + $0x28] sm:$0xff] %vm313_vm0, %v1065_v11 }
 0x355   :  { %v1799_v12 = vpop.f32.mrf.mxu1 }
 0x356   :  { %1245 = vrot.lane.b32.xlu1 %v1799_v12, %s1932_s21 }
 0x357   :  { %v1220_v13 = vpop.f32.mrf.mxu1 }
 0x358   :  { %1243 = vrot.lane.b32.xlu0 %v1220_v13, %s1932_s21 }
 0x359   :  { %v1802_v14 = vpop.f32.mrf.mxu1 }
 0x35a   :  { %1249 = vrot.lane.b32.xlu1 %v1802_v14, %s1932_s21 }
 0x35b   :  { %v1230_v15 = vpop.f32.mrf.mxu1 }
 0x35c   :  { %1247 = vrot.lane.b32.xlu0 %v1230_v15, %s1932_s21 }
 0x35d   :  { %v1813_v16 = vpop.f32.mrf.mxu1 }
 0x35e   :  { %1418 = vrot.lane.b32.xlu1 %v1813_v16, %s1931_s1 }
 0x35f   :  { %v1393_v17 = vpop.f32.mrf.mxu1 }
 0x360   :  { %1416 = vrot.lane.b32.xlu0 %v1393_v17, %s1931_s1 }
 0x361   :  { %v1816_v18 = vpop.f32.mrf.mxu1 }
 0x362   :  { %1422 = vrot.lane.b32.xlu1 %v1816_v18, %s1931_s1 }
 0x363   :  { %v1403_v19 = vpop.f32.mrf.mxu1 }
 0x364   :  { %1420 = vrot.lane.b32.xlu0 %v1403_v19, %s1931_s1 }
 0x365   :  { %v1827_v20 = vpop.f32.mrf.mxu1 }
 0x366   :  { %1591 = vrot.lane.b32.xlu1 %v1827_v20, %s1930_s0 }
 0x367   :  { %v1566_v21 = vpop.f32.mrf.mxu1 }
 0x368   :  { %1589 = vrot.lane.b32.xlu0 %v1566_v21, %s1930_s0 }
 0x36d   :  { %v1830_v22 = vpop.f32.mrf.mxu1 }
 0x36e   :  { %1595 = vrot.lane.b32.xlu1 %v1830_v22, %s1930_s0 }
 0x36f   :  { %v1576_v23 = vpop.f32.mrf.mxu1 }
 0x370   :  { %1593 = vrot.lane.b32.xlu0 %v1576_v23, %s1930_s0 }
 0x398   :  { %v583_v25 = vpop.permute.xlu0 %582 }
 0x399   :  { %594 = vst.msk [vmem:[#allocation7 + $0x10] sm:$0xff] %vm592_vm1, %v583_v25 }
 0x39a   :  { %v581_v26 = vpop.permute.xlu1 %580 }
 0x39b   :  { %593 = vst.msk [vmem:[#allocation7] sm:$0xff] %vm592_vm1, %v581_v26 }
 0x3a0   :  { %v587_v27 = vpop.permute.xlu1 %586 }
 0x3a1   :  { %596 = vst.msk [vmem:[#allocation7 + $0x30] sm:$0xff] %vm592_vm1, %v587_v27 }
 0x3a4   :  { %v585_v28 = vpop.permute.xlu1 %584 }
 0x3a5   :  { %595 = vst.msk [vmem:[#allocation7 + $0x20] sm:$0xff] %vm592_vm1, %v585_v28 }
 0x3a8   :  { %v757_v8 = vpop.permute.xlu1 %756 }
 0x3a9   :  { %768 = vst.msk [vmem:[#allocation7 + $0x10] sm:$0xff] %vm766_vm2, %v757_v8 }
 0x3ac   :  { %v755_v29 = vpop.permute.xlu1 %754 }
 0x3ad   :  { %767 = vst.msk [vmem:[#allocation7] sm:$0xff] %vm766_vm2, %v755_v29 }
 0x3b0   :  { %v761_v30 = vpop.permute.xlu1 %760 }
 0x3b1   :  { %770 = vst.msk [vmem:[#allocation7 + $0x30] sm:$0xff] %vm766_vm2, %v761_v30 }
 0x3b4   :  { %v759_v31 = vpop.permute.xlu1 %758 }
 0x3b5   :  { %769 = vst.msk [vmem:[#allocation7 + $0x20] sm:$0xff] %vm766_vm2, %v759_v31 }
 0x3b6   :  { %v929_v32 = vpop.permute.xlu0 %928 }
 0x3b7   :  { %941 = vst.msk [vmem:[#allocation7] sm:$0xff] %vm940_vm3, %v929_v32 }
 0x3b8   :  { %v931_v33 = vpop.permute.xlu1 %930 }
 0x3b9   :  { %942 = vst.msk [vmem:[#allocation7 + $0x10] sm:$0xff] %vm940_vm3, %v931_v33 }
 0x3bc   :  { %v935_v34 = vpop.permute.xlu1 %934 }
 0x3bd   :  { %944 = vst.msk [vmem:[#allocation7 + $0x30] sm:$0xff] %vm940_vm3, %v935_v34 }
 0x3be   :  { %v933_v35 = vpop.permute.xlu0 %932 }
 0x3bf   :  { %943 = vst.msk [vmem:[#allocation7 + $0x20] sm:$0xff] %vm940_vm3, %v933_v35 }
 0x3c8   :  { %v1246_v36 = vpop.permute.xlu1 %1245 }
 0x3c9   :  { %1256 = vst.msk [vmem:[#allocation7 + $0x18] sm:$0xff] %vm592_vm1, %v1246_v36 }
 0x3ca   :  { %v1244_v37 = vpop.permute.xlu0 %1243 }
 0x3cb   :  { %1255 = vst.msk [vmem:[#allocation7 + $0x8] sm:$0xff] %vm592_vm1, %v1244_v37 }
 0x3cc   :  { %v1250_v38 = vpop.permute.xlu1 %1249 }
 0x3cd   :  { %1258 = vst.msk [vmem:[#allocation7 + $0x38] sm:$0xff] %vm592_vm1, %v1250_v38 }
 0x3ce   :  { %v1248_v39 = vpop.permute.xlu0 %1247 }
 0x3cf   :  { %1257 = vst.msk [vmem:[#allocation7 + $0x28] sm:$0xff] %vm592_vm1, %v1248_v39 }
 0x3d0   :  { %v1419_v40 = vpop.permute.xlu1 %1418 }
 0x3d1   :  { %1429 = vst.msk [vmem:[#allocation7 + $0x18] sm:$0xff] %vm766_vm2, %v1419_v40 }
 0x3d2   :  { %v1417_v41 = vpop.permute.xlu0 %1416 }
 0x3d3   :  { %1428 = vst.msk [vmem:[#allocation7 + $0x8] sm:$0xff] %vm766_vm2, %v1417_v41 }
 0x3d4   :  { %v1423_v42 = vpop.permute.xlu1 %1422 }
 0x3d5   :  { %1431 = vst.msk [vmem:[#allocation7 + $0x38] sm:$0xff] %vm766_vm2, %v1423_v42 }
 0x3d6   :  { %v1421_v6 = vpop.permute.xlu0 %1420 }
 0x3d7   :  { %1430 = vst.msk [vmem:[#allocation7 + $0x28] sm:$0xff] %vm766_vm2, %v1421_v6 }
 0x3d8   :  { %v1592_v7 = vpop.permute.xlu1 %1591 }
 0x3d9   :  { %1602 = vst.msk [vmem:[#allocation7 + $0x18] sm:$0xff] %vm940_vm3, %v1592_v7 }
 0x3da   :  { %v1590_v24 = vpop.permute.xlu0 %1589 }
 0x3db   :  { %1601 = vst.msk [vmem:[#allocation7 + $0x8] sm:$0xff] %vm940_vm3, %v1590_v24 }
 0x3e0   :  { %v1596_v5 = vpop.permute.xlu1 %1595 }
 0x3e1   :  { %1604 = vst.msk [vmem:[#allocation7 + $0x38] sm:$0xff] %vm940_vm3, %v1596_v5 }
 0x3e2   :  { %v1594_v43 = vpop.permute.xlu0 %1593 }
 0x3e3   :  { %1603 = vst.msk [vmem:[#allocation7 + $0x28] sm:$0xff] %vm940_vm3, %v1594_v43 }
 0x3e4   :  { %1911 = shalt.err (!%p1908_p0)
}
 0x3e5   :  { %1616 = dma.vmem_to_hbm [thread:$0]  %s1611_s23, 1024, %s2289_s2, [#allocation4], %s1927_s12, %s1927_s12, %s1928_s13  }
 0x3e6   :  { %1924 = dma.done.wait [#allocation4], 1024  }
 0x3e7   :  { %1925 = vsyncadd [#allocation4], 4294966272 }
 0x3e8   :  { %1620 = vsyncpa [#allocation3], 1 }
 0x3e9   :  { %1621 = vsyncpa [#allocation6], 1 }
 0x3ea   :  { %1622 = vsyncpa [#allocation4], 1 }

</bundles_post_ra>
